<compile_context>
chip_gen: v5e
topology: v5e:2x2
jax: 0.10.0
libtpu: 0.0.40
codegen_flags: <defaults>
</compile_context>

<pallas_src>
import functools
import math

import jax
import jax.numpy as jnp
from jax import lax
from jax.experimental import pallas as pl
from jax.experimental.pallas import tpu as pltpu

BOARD = 8                    # the module hard-codes an 8x8 board (num_filters * 8 * 8)
NSQ = BOARD * BOARD          # 64 squares
_LANE = 128
_SUBLANE = 8
_BN_EPS = 1e-5


def _round_up(x, m):
    return ((x + m - 1) // m) * m


def _pick_tile_b(batch, channels, filters, vmem_budget_bytes=8 * 1024 * 1024):
    """Largest batch tile (multiple of 8, <= 512) whose double-buffered x block
    plus the conv scratch fits the VMEM budget.  The last dim of every VMEM
    buffer is lane-padded to 128, so budget with the padded widths."""
    c_lanes = _round_up(max(channels, 1), _LANE)
    f_lanes = _round_up(max(filters, 1), _LANE)
    bytes_per_batch_row = NSQ * 4 * (2 * c_lanes + f_lanes)   # f32
    tile = vmem_budget_bytes // bytes_per_batch_row
    tile = (tile // _SUBLANE) * _SUBLANE
    tile = max(_SUBLANE, min(512, tile))
    tile = min(tile, _round_up(batch, _SUBLANE))
    return int(tile)


# --------------------------------------------------------------------------- #
# Fused kernel: one batch tile per grid step.
#   x_ref  : (64, tile_b, C)   f32   rows = (square, batch), lanes = channel
#   wc_ref : (C, F)            f32   conv weight * BN scale (pre-transposed)
#   bc_ref : (1, F)            f32   folded BN bias
#   w1_ref : (64, F, hidden)   f32   fc1 weight, permuted to [square, filter, hidden]
#   b1_ref : (1, hidden)       f32
#   w2_ref : (hidden, O_pad)   f32   fc_out weight (padded to 128 output lanes)
#   b2_ref : (1, O_pad)        f32
#   o_ref  : (tile_b, O_pad)   f32
#   z_ref  : (64, tile_b, F)   f32   VMEM scratch -- conv output never hits HBM
# --------------------------------------------------------------------------- #
def _fused_head_kernel(x_ref, wc_ref, bc_ref, w1_ref, b1_ref, w2_ref, b2_ref,
                       o_ref, z_ref, *, apply_relu):
    nsq, tile_b, c = x_ref.shape
    f = wc_ref.shape[1]
    hidden = w1_ref.shape[2]

    # --- 1x1 conv with eval-mode BatchNorm folded in, + ReLU ----------------
    # (square, batch) rows x channel lanes -> a single lane-contracting matmul.
    # The leading-dim collapse is layout-preserving (tile_b % 8 == 0).
    x2 = x_ref[...].reshape(nsq * tile_b, c)
    z = jnp.dot(x2, wc_ref[...], preferred_element_type=jnp.float32)
    z = jnp.maximum(z + bc_ref[...], 0.0)
    z_ref[...] = z.reshape(nsq, tile_b, f)          # stays in VMEM only

    # --- fc1: contract over (square, filter) --------------------------------
    # fc1's columns were pre-permuted to [square, filter, hidden], so each step
    # is a plain 2D matmul on a contiguous (tile_b, F) slab of the scratch.
    def fc1_step(s, acc):
        return acc + jnp.dot(z_ref[s], w1_ref[s],
                             preferred_element_type=jnp.float32)

    h1 = lax.fori_loop(0, nsq, fc1_step,
                       jnp.zeros((tile_b, hidden), jnp.float32))
    h1 = h1 + b1_ref[...]                            # no ReLU here (matches module)

    # --- fc_out (+ optional final ReLU) -------------------------------------
    out = jnp.dot(h1, w2_ref[...], preferred_element_type=jnp.float32)
    out = out + b2_ref[...]
    if apply_relu:
        out = jnp.maximum(out, 0.0)
    o_ref[...] = out


def prepare_head_params(conv_w, bn_gamma, bn_beta, bn_mean, bn_var,
                        fc1_w, fc1_b, fc2_w, fc2_b, eps=_BN_EPS):
    """Fold eval-mode BatchNorm into the 1x1 conv and lay the weights out for
    the fused kernel.  PyTorch layouts:
      conv_w: (F, C, 1, 1)   fc1_w: (hidden, F*64)   fc2_w: (out_dim, hidden)
    Only the final output dim is padded (to 128 lanes, for an unmasked store);
    C / F / hidden keep their natural sizes.
    """
    F, C = conv_w.shape[0], conv_w.shape[1]
    hidden = fc1_w.shape[0]
    out_dim = fc2_w.shape[0]
    o_pad = _round_up(out_dim, _LANE)

    # TODO(synk): training-mode BatchNorm (batch statistics) is not implemented;
    # only the eval-mode running-stats fold is supported.
    scale = bn_gamma / jnp.sqrt(bn_var + eps)                          # (F,)
    wc = (conv_w[:, :, 0, 0] * scale[:, None]).T.astype(jnp.float32)   # (C, F)
    bc = (bn_beta - bn_mean * scale).reshape(1, F).astype(jnp.float32)

    # PyTorch flatten order is f*64 + s; the kernel contracts square-by-square
    # with filters on lanes, so pre-permute fc1 to [square, filter, hidden].
    w1 = jnp.transpose(fc1_w.reshape(hidden, F, NSQ), (2, 1, 0)).astype(jnp.float32)
    b1 = fc1_b.reshape(1, hidden).astype(jnp.float32)

    w2 = jnp.zeros((hidden, o_pad), jnp.float32).at[:, :out_dim].set(fc2_w.T)
    b2 = jnp.zeros((1, o_pad), jnp.float32).at[0, :out_dim].set(fc2_b)

    return {"wc": wc, "bc": bc, "w1": w1, "b1": b1, "w2": w2, "b2": b2,
            "out_dim": out_dim, "num_filters": F, "in_channels": C}


def conv_value_or_moves_left_head(x, params, *, apply_relu):
    """x: (B, C, 8, 8) float (NCHW, as the PyTorch module).  Returns (B, out_dim) f32."""
    B, C, Hs, Ws = x.shape
    assert (Hs, Ws) == (BOARD, BOARD), "module flattens num_filters * 8 * 8"
    assert C == params["in_channels"]

    wc, bc = params["wc"], params["bc"]
    w1, b1 = params["w1"], params["b1"]
    w2, b2 = params["w2"], params["b2"]
    F = wc.shape[1]
    hidden = w1.shape[2]
    o_pad = w2.shape[1]

    # NCHW -> (square, batch, channel).  This is the only host-side relayout
    # left; a producer emitting channels-last activations would make it a free
    # reshape (review item: "accept the activation as NHWC from the producer").
    x_sq = jnp.transpose(x, (2, 3, 0, 1)).reshape(NSQ, B, C).astype(jnp.float32)

    tile_b = _pick_tile_b(B, C, F)
    B_pad = _round_up(B, tile_b)
    if B_pad != B:
        # Padded rows produce relu(folded_bias) and flow through fc1/fc_out;
        # they are sliced off below (wasted compute < one tile).
        x_sq = jnp.pad(x_sq, ((0, 0), (0, B_pad - B), (0, 0)))
    grid = (B_pad // tile_b,)

    cost = pl.CostEstimate(
        flops=2 * B_pad * NSQ * C * F
              + 2 * B_pad * NSQ * F * hidden
              + 2 * B_pad * hidden * o_pad,
        transcendentals=0,
        bytes_accessed=4 * (NSQ * B_pad * C + C * F + F + NSQ * F * hidden
                            + hidden + hidden * o_pad + o_pad + B_pad * o_pad),
    )

    out = pl.pallas_call(
        functools.partial(_fused_head_kernel, apply_relu=apply_relu),
        out_shape=jax.ShapeDtypeStruct((B_pad, o_pad), jnp.float32),
        grid_spec=pltpu.PrefetchScalarGridSpec(
            num_scalar_prefetch=0,
            grid=grid,
            in_specs=[
                pl.BlockSpec((NSQ, tile_b, C), lambda i: (0, i, 0)),   # x tile
                pl.BlockSpec((C, F), lambda i: (0, 0)),                # conv*BN weight
                pl.BlockSpec((1, F), lambda i: (0, 0)),                # folded BN bias
                pl.BlockSpec((NSQ, F, hidden), lambda i: (0, 0, 0)),   # fc1 weight
                pl.BlockSpec((1, hidden), lambda i: (0, 0)),           # fc1 bias
                pl.BlockSpec((hidden, o_pad), lambda i: (0, 0)),       # fc_out weight
                pl.BlockSpec((1, o_pad), lambda i: (0, 0)),            # fc_out bias
            ],
            out_specs=pl.BlockSpec((tile_b, o_pad), lambda i: (i, 0)),
            scratch_shapes=[pltpu.VMEM((NSQ, tile_b, F), jnp.float32)],
        ),
        compiler_params=pltpu.CompilerParams(
            dimension_semantics=("parallel",),          # batch tiles are independent
            vmem_limit_bytes=32 * 1024 * 1024,          # explicit budget (v7x review item)
        ),
        cost_estimate=cost,
    )(x_sq, wc, bc, w1, b1, w2, b2)

    # Slice off batch padding and the lane-dense output padding.
    return out[:B, :params["out_dim"]]


if __name__ == "__main__":
    # Small shapes consistent with the module: 8x8 board, a handful of channels.
    B, C = 2, 4                 # batch, input channels (input_dim)
    F = 4                       # num_filters
    hidden_dim = 32
    output_dim = 3
    apply_relu = True

    key = jax.random.PRNGKey(0)
    ks = jax.random.split(key, 10)

    x = jax.random.normal(ks[0], (B, C, BOARD, BOARD), jnp.float32)

    # PyTorch-layout parameters (weights are (out, in, ...), xavier_normal_).
    conv_w = math.sqrt(2.0 / (C + F)) * jax.random.normal(ks[1], (F, C, 1, 1), jnp.float32)
    bn_gamma = 1.0 + 0.3 * jax.random.normal(ks[2], (F,), jnp.float32)
    bn_beta = 0.1 * jax.random.normal(ks[3], (F,), jnp.float32)
    bn_mean = 0.1 * jax.random.normal(ks[4], (F,), jnp.float32)
    bn_var = 1.0 + 0.2 * jax.random.uniform(ks[5], (F,), jnp.float32)

    in1 = F * NSQ
    fc1_w = math.sqrt(2.0 / (in1 + hidden_dim)) * jax.random.normal(
        ks[6], (hidden_dim, in1), jnp.float32)
    fc1_b = jax.random.uniform(ks[7], (hidden_dim,), jnp.float32,
                               -1.0 / math.sqrt(in1), 1.0 / math.sqrt(in1))
    fc2_w = math.sqrt(2.0 / (hidden_dim + output_dim)) * jax.random.normal(
        ks[8], (output_dim, hidden_dim), jnp.float32)
    fc2_b = jax.random.uniform(ks[9], (output_dim,), jnp.float32,
                               -1.0 / math.sqrt(hidden_dim), 1.0 / math.sqrt(hidden_dim))

    params = prepare_head_params(conv_w, bn_gamma, bn_beta, bn_mean, bn_var,
                                 fc1_w, fc1_b, fc2_w, fc2_b)

    out = conv_value_or_moves_left_head(x, params, apply_relu=apply_relu)
    out = jax.block_until_ready(out)

    # Pure-JAX f32 reference with the exact module semantics (eval-mode BN).
    hp = jax.lax.Precision.HIGHEST
    scale = bn_gamma / jnp.sqrt(bn_var + _BN_EPS)
    w_eff = conv_w[:, :, 0, 0] * scale[:, None]
    b_eff = bn_beta - bn_mean * scale
    z_ref = jnp.einsum("bchw,fc->bfhw", x, w_eff, precision=hp) \
        + b_eff[None, :, None, None]
    z_ref = jnp.maximum(z_ref, 0.0)
    flat = z_ref.reshape(B, F * NSQ)
    h1_ref = jnp.dot(flat, fc1_w.T, precision=hp) + fc1_b
    ref = jnp.dot(h1_ref, fc2_w.T, precision=hp) + fc2_b
    if apply_relu:
        ref = jnp.maximum(ref, 0.0)

    assert out.shape == (B, output_dim)
    assert jnp.allclose(out, ref, atol=2e-2, rtol=2e-2), (out, ref)

    print("KERNEL_OK")
</pallas_src>

<mosaic_0001>
module attributes {stable_mosaic.version = 11 : i64} {
  func.func @_fused_head_kernel(%arg0: i32, %arg1: memref<64x8x4xf32, #tpu.memory_space<vmem>>, %arg2: memref<4x4xf32, #tpu.memory_space<vmem>>, %arg3: memref<1x4xf32, #tpu.memory_space<vmem>>, %arg4: memref<64x4x32xf32, #tpu.memory_space<vmem>>, %arg5: memref<1x32xf32, #tpu.memory_space<vmem>>, %arg6: memref<32x128xf32, #tpu.memory_space<vmem>>, %arg7: memref<1x128xf32, #tpu.memory_space<vmem>>, %arg8: memref<8x128xf32, #tpu.memory_space<vmem>>, %arg9: memref<64x8x4xf32, #tpu.memory_space<vmem>>) attributes {dimension_semantics = [#tpu.dimension_semantics<parallel>], iteration_bounds = array<i64: 1>, scalar_prefetch = 0 : i64, scratch_operands = 1 : i64, tpu.core_type = #tpu.core_type<tc>, window_params = [{transform_indices = @transform_0, window_bounds = array<i64: 64, 8, 4>}, {pipeline_mode = #tpu.pipeline_mode<synchronous>, transform_indices = @transform_1, window_bounds = array<i64: 4, 4>}, {pipeline_mode = #tpu.pipeline_mode<synchronous>, transform_indices = @transform_2, window_bounds = array<i64: 1, 4>}, {pipeline_mode = #tpu.pipeline_mode<synchronous>, transform_indices = @transform_3, window_bounds = array<i64: 64, 4, 32>}, {pipeline_mode = #tpu.pipeline_mode<synchronous>, transform_indices = @transform_4, window_bounds = array<i64: 1, 32>}, {pipeline_mode = #tpu.pipeline_mode<synchronous>, transform_indices = @transform_5, window_bounds = array<i64: 32, 128>}, {pipeline_mode = #tpu.pipeline_mode<synchronous>, transform_indices = @transform_6, window_bounds = array<i64: 1, 128>}, {transform_indices = @transform_7, window_bounds = array<i64: 8, 128>}]} {
    %c0 = arith.constant 0 : index
    %c0_0 = arith.constant 0 : index
    %c0_1 = arith.constant 0 : index
    %0 = vector.load %arg1[%c0, %c0_0, %c0_1] : memref<64x8x4xf32, #tpu.memory_space<vmem>>, vector<64x8x4xf32>
    %1 = vector.shape_cast %0 : vector<64x8x4xf32> to vector<512x4xf32>
    %c0_2 = arith.constant 0 : index
    %c0_3 = arith.constant 0 : index
    %2 = vector.load %arg2[%c0_2, %c0_3] : memref<4x4xf32, #tpu.memory_space<vmem>>, vector<4x4xf32>
    %cst = arith.constant dense<0.000000e+00> : vector<512x4xf32>
    %3 = tpu.matmul %1, %2, %cst {dimension_numbers = #tpu.dot_dimension_numbers<[1], [0], [0], [1], [0, 0, 1, 1], [], []>} : vector<512x4xf32>, vector<4x4xf32>, vector<512x4xf32> -> vector<512x4xf32>
    %c0_4 = arith.constant 0 : index
    %c0_5 = arith.constant 0 : index
    %4 = vector.load %arg3[%c0_4, %c0_5] : memref<1x4xf32, #tpu.memory_space<vmem>>, vector<1x4xf32>
    %5 = vector.broadcast %4 : vector<1x4xf32> to vector<512x4xf32>
    %6 = arith.addf %3, %5 : vector<512x4xf32>
    %cst_6 = arith.constant 0.000000e+00 : f32
    %7 = vector.broadcast %cst_6 : f32 to vector<512x4xf32>
    %8 = arith.maximumf %6, %7 : vector<512x4xf32>
    %9 = vector.shape_cast %8 : vector<512x4xf32> to vector<64x8x4xf32>
    %c0_7 = arith.constant 0 : index
    %c0_8 = arith.constant 0 : index
    %c0_9 = arith.constant 0 : index
    %10 = vector.load %arg9[%c0_7, %c0_8, %c0_9] : memref<64x8x4xf32, #tpu.memory_space<vmem>>, vector<64x8x4xf32>
    tpu.vector_store %arg9[%c0_7, %c0_8, %c0_9], %9 {strides = array<i32>} : memref<64x8x4xf32, #tpu.memory_space<vmem>>, vector<64x8x4xf32>,
    %cst_10 = arith.constant 0.000000e+00 : f32
    %11 = vector.broadcast %cst_10 : f32 to vector<8x32xf32>
    %c0_i32 = arith.constant 0 : i32
    %c64_i32 = arith.constant 64 : i32
    %12 = arith.addi %c0_i32, %c64_i32 : i32
    %c1_i32 = arith.constant 1 : i32
    %13 = scf.for %arg10 = %c0_i32 to %12 step %c1_i32 iter_args(%arg11 = %11) -> (vector<8x32xf32>)  : i32 {
      %25 = arith.index_cast %arg10 : i32 to index
      %c0_22 = arith.constant 0 : index
      %c0_23 = arith.constant 0 : index
      %26 = vector.load %arg9[%25, %c0_22, %c0_23] : memref<64x8x4xf32, #tpu.memory_space<vmem>>, vector<1x8x4xf32>
      %27 = vector.shape_cast %26 : vector<1x8x4xf32> to vector<8x4xf32>
      %28 = arith.index_cast %arg10 : i32 to index
      %c0_24 = arith.constant 0 : index
      %c0_25 = arith.constant 0 : index
      %29 = vector.load %arg4[%28, %c0_24, %c0_25] : memref<64x4x32xf32, #tpu.memory_space<vmem>>, vector<1x4x32xf32>
      %30 = vector.shape_cast %29 : vector<1x4x32xf32> to vector<4x32xf32>
      %cst_26 = arith.constant dense<0.000000e+00> : vector<8x32xf32>
      %31 = tpu.matmul %27, %30, %cst_26 {dimension_numbers = #tpu.dot_dimension_numbers<[1], [0], [0], [1], [0, 0, 1, 1], [], []>} : vector<8x4xf32>, vector<4x32xf32>, vector<8x32xf32> -> vector<8x32xf32>
      %32 = arith.addf %arg11, %31 : vector<8x32xf32>
      scf.yield %32 : vector<8x32xf32>
    }
    %c64_i32_11 = arith.constant 64 : i32
    %c0_12 = arith.constant 0 : index
    %c0_13 = arith.constant 0 : index
    %14 = vector.load %arg5[%c0_12, %c0_13] : memref<1x32xf32, #tpu.memory_space<vmem>>, vector<1x32xf32>
    %15 = vector.broadcast %14 : vector<1x32xf32> to vector<8x32xf32>
    %16 = arith.addf %13, %15 : vector<8x32xf32>
    %c0_14 = arith.constant 0 : index
    %c0_15 = arith.constant 0 : index
    %17 = vector.load %arg6[%c0_14, %c0_15] : memref<32x128xf32, #tpu.memory_space<vmem>>, vector<32x128xf32>
    %cst_16 = arith.constant dense<0.000000e+00> : vector<8x128xf32>
    %18 = tpu.matmul %16, %17, %cst_16 {dimension_numbers = #tpu.dot_dimension_numbers<[1], [0], [0], [1], [0, 0, 1, 1], [], []>} : vector<8x32xf32>, vector<32x128xf32>, vector<8x128xf32> -> vector<8x128xf32>
    %c0_17 = arith.constant 0 : index
    %c0_18 = arith.constant 0 : index
    %19 = vector.load %arg7[%c0_17, %c0_18] : memref<1x128xf32, #tpu.memory_space<vmem>>, vector<1x128xf32>
    %20 = vector.broadcast %19 : vector<1x128xf32> to vector<8x128xf32>
    %21 = arith.addf %18, %20 : vector<8x128xf32>
    %cst_19 = arith.constant 0.000000e+00 : f32
    %22 = vector.broadcast %cst_19 : f32 to vector<8x128xf32>
    %23 = arith.maximumf %21, %22 : vector<8x128xf32>
    %c0_20 = arith.constant 0 : index
    %c0_21 = arith.constant 0 : index
    %24 = vector.load %arg8[%c0_20, %c0_21] : memref<8x128xf32, #tpu.memory_space<vmem>>, vector<8x128xf32>
    tpu.vector_store %arg8[%c0_20, %c0_21], %23 {strides = array<i32>} : memref<8x128xf32, #tpu.memory_space<vmem>>, vector<8x128xf32>,
    return
  }
  func.func @transform_0(%arg0: i32) -> (i32, i32, i32) {
    %c0_i32 = arith.constant 0 : i32
    %c0_i32_0 = arith.constant 0 : i32
    %c0_i32_1 = arith.constant 0 : i32
    return %c0_i32, %arg0, %c0_i32_0 : i32, i32, i32
  }
  func.func @transform_1(%arg0: i32) -> (i32, i32) {
    %c0_i32 = arith.constant 0 : i32
    %c0_i32_0 = arith.constant 0 : i32
    %c0_i32_1 = arith.constant 0 : i32
    return %c0_i32, %c0_i32_0 : i32, i32
  }
  func.func @transform_2(%arg0: i32) -> (i32, i32) {
    %c0_i32 = arith.constant 0 : i32
    %c0_i32_0 = arith.constant 0 : i32
    %c0_i32_1 = arith.constant 0 : i32
    return %c0_i32, %c0_i32_0 : i32, i32
  }
  func.func @transform_3(%arg0: i32) -> (i32, i32, i32) {
    %c0_i32 = arith.constant 0 : i32
    %c0_i32_0 = arith.constant 0 : i32
    %c0_i32_1 = arith.constant 0 : i32
    %c0_i32_2 = arith.constant 0 : i32
    return %c0_i32, %c0_i32_0, %c0_i32_1 : i32, i32, i32
  }
  func.func @transform_4(%arg0: i32) -> (i32, i32) {
    %c0_i32 = arith.constant 0 : i32
    %c0_i32_0 = arith.constant 0 : i32
    %c0_i32_1 = arith.constant 0 : i32
    return %c0_i32, %c0_i32_0 : i32, i32
  }
  func.func @transform_5(%arg0: i32) -> (i32, i32) {
    %c0_i32 = arith.constant 0 : i32
    %c0_i32_0 = arith.constant 0 : i32
    %c0_i32_1 = arith.constant 0 : i32
    return %c0_i32, %c0_i32_0 : i32, i32
  }
  func.func @transform_6(%arg0: i32) -> (i32, i32) {
    %c0_i32 = arith.constant 0 : i32
    %c0_i32_0 = arith.constant 0 : i32
    %c0_i32_1 = arith.constant 0 : i32
    return %c0_i32, %c0_i32_0 : i32, i32
  }
  func.func @transform_7(%arg0: i32) -> (i32, i32) {
    %c0_i32 = arith.constant 0 : i32
    %c0_i32_0 = arith.constant 0 : i32
    return %arg0, %c0_i32 : i32, i32
  }
}

</mosaic_0001>

<bundles_post_ra>
// kernel: tpu_custom_call.1
= control target key start
LH: loop header
LB: loop body
LE: loop exit
PB: predicated region body
PF: predicated region fallthrough
CT: control target
= control target key end

     0   :  { %vm289_vm0 = vcmask 1043456   ;;  %vm96_vm1 = vcmask 31744   ;;  %s1335_s0 = inlined_call_operand.vmem [shape: f32[64,8,4], index: 0, kind: input, shape index: {}]   ;;  %s1336_s1 = inlined_call_operand.vmem [shape: f32[4,4], index: 1, kind: input, shape index: {}]   ;;  %s1337_s2 = inlined_call_operand.vmem [shape: f32[1,4], index: 2, kind: input, shape index: {}]   ;;  %s1338_s3 = inlined_call_operand.vmem [shape: f32[64,4,32], index: 3, kind: input, shape index: {}]   ;;  %s1339_s4 = inlined_call_operand.vmem [shape: f32[1,32], index: 4, kind: input, shape index: {}]   ;;  %s1340_s5 = inlined_call_operand.vmem [shape: f32[32,128], index: 5, kind: input, shape index: {}]   ;;  %s1341_s6 = inlined_call_operand.vmem [shape: f32[1,128], index: 6, kind: input, shape index: {}]   ;;  %s1342_s7 = inlined_call_operand.hbm [shape: f32[8,128], index: 7, kind: output, shape index: {}]  }
   0x1   :  { %v91_v0 = vld [vmem:[%s1336_s1] sm:$0xf] }
   0x2   :  { %v59_v1 = vld [vmem:[%s1335_s0 + $0x100] sm:$0xff]  ;;  %808 = vmatpush.msk.msra.mxu2 %vm289_vm0, %v91_v0  ;;  %809 = vmatpush.msk.msra.mxu3 %vm289_vm0, %v91_v0 }
   0x3   :  { %v75_v2 = vld [vmem:[%s1335_s0 + $0x180] sm:$0xff] }
   0x4   :  { %12 = vsyncpa [#allocation4], 0  ;;  %v27_v3 = vld [vmem:[%s1335_s0] sm:$0xff]  ;;  %770 = vmatmul.msk.f32.vlgmr.msra.gmra.mxu2 %vm96_vm1, %v59_v1  ;;  %786 = vmatmul.msk.f32.vlgmr.msra.gmra.mxu3 %vm96_vm1, %v75_v2  ;;  %v60_v5 = vld [vmem:[%s1335_s0 + $0x108] sm:$0xff] }
   0x5   :  { %v43_v4 = vld [vmem:[%s1335_s0 + $0x80] sm:$0xff]  ;;  %737 = vmatpush.msk.msra.mxu0 %vm289_vm0, %v91_v0  ;;  %807 = vmatpush.msk.msra.mxu1 %vm289_vm0, %v91_v0  ;;  %v76_v6 = vld [vmem:[%s1335_s0 + $0x188] sm:$0xff]  ;;  %v61_v9 = vld [vmem:[%s1335_s0 + $0x110] sm:$0xff] }
   0x6   :  { %738 = vmatmul.msk.f32.vlgmr.msra.gmra.mxu0 %vm96_vm1, %v27_v3  ;;  %754 = vmatmul.msk.f32.vlgmr.msra.gmra.mxu1 %vm96_vm1, %v43_v4  ;;  %v28_v7 = vld [vmem:[%s1335_s0 + $0x8] sm:$0xff]  ;;  %v77_v10 = vld [vmem:[%s1335_s0 + $0x190] sm:$0xff]  ;;  %v62_v13 = vld [vmem:[%s1335_s0 + $0x118] sm:$0xff] }
   0x7   :  { %v44_v8 = vld [vmem:[%s1335_s0 + $0x88] sm:$0xff]  ;;  %v29_v11 = vld [vmem:[%s1335_s0 + $0x10] sm:$0xff]  ;;  %v78_v14 = vld [vmem:[%s1335_s0 + $0x198] sm:$0xff] }
   0x8   :  { %v45_v12 = vld [vmem:[%s1335_s0 + $0x90] sm:$0xff]  ;;  %v30_v15 = vld [vmem:[%s1335_s0 + $0x18] sm:$0xff]  ;;  %v63_v17 = vld [vmem:[%s1335_s0 + $0x120] sm:$0xff] }
   0x9   :  { %v46_v16 = vld [vmem:[%s1335_s0 + $0x98] sm:$0xff]  ;;  %v79_v18 = vld [vmem:[%s1335_s0 + $0x1a0] sm:$0xff]  ;;  %v64_v21 = vld [vmem:[%s1335_s0 + $0x128] sm:$0xff] }
   0xa   :  { %v31_v19 = vld [vmem:[%s1335_s0 + $0x20] sm:$0xff]  ;;  %v80_v22 = vld [vmem:[%s1335_s0 + $0x1a8] sm:$0xff]  ;;  %v65_v25 = vld [vmem:[%s1335_s0 + $0x130] sm:$0xff] }
   0xb   :  { %v47_v20 = vld [vmem:[%s1335_s0 + $0xa0] sm:$0xff]  ;;  %v32_v23 = vld [vmem:[%s1335_s0 + $0x28] sm:$0xff]  ;;  %v81_v26 = vld [vmem:[%s1335_s0 + $0x1b0] sm:$0xff] }
   0xc   :  { %771 = vmatmul.msk.f32.gmra.mxu2 %vm96_vm1, %v60_v5  ;;  %787 = vmatmul.msk.f32.gmra.mxu3 %vm96_vm1, %v76_v6  ;;  %v48_v24 = vld [vmem:[%s1335_s0 + $0xa8] sm:$0xff]  ;;  %v33_v27 = vld [vmem:[%s1335_s0 + $0x30] sm:$0xff]  ;;  %v66_v29 = vld [vmem:[%s1335_s0 + $0x138] sm:$0xff] }
   0xd   :  { %v49_v28 = vld [vmem:[%s1335_s0 + $0xb0] sm:$0xff]  ;;  %v82_v30 = vld [vmem:[%s1335_s0 + $0x1b8] sm:$0xff]  ;;  %v67_v33 = vld [vmem:[%s1335_s0 + $0x140] sm:$0xff] }
   0xe   :  { %739 = vmatmul.msk.f32.gmra.mxu0 %vm96_vm1, %v28_v7  ;;  %755 = vmatmul.msk.f32.gmra.mxu1 %vm96_vm1, %v44_v8  ;;  %v34_v31 = vld [vmem:[%s1335_s0 + $0x38] sm:$0xff]  ;;  %v83_v34 = vld [vmem:[%s1335_s0 + $0x1c0] sm:$0xff]  ;;  %v68_v37 = vld [vmem:[%s1335_s0 + $0x148] sm:$0xff] }
   0xf   :  { %v50_v32 = vld [vmem:[%s1335_s0 + $0xb8] sm:$0xff]  ;;  %v35_v35 = vld [vmem:[%s1335_s0 + $0x40] sm:$0xff]  ;;  %v84_v38 = vld [vmem:[%s1335_s0 + $0x1c8] sm:$0xff] }
  0x10   :  { %v51_v36 = vld [vmem:[%s1335_s0 + $0xc0] sm:$0xff]  ;;  %v36_v39 = vld [vmem:[%s1335_s0 + $0x48] sm:$0xff]  ;;  %v69_v41 = vld [vmem:[%s1335_s0 + $0x150] sm:$0xff] }
  0x11   :  { %v52_v40 = vld [vmem:[%s1335_s0 + $0xc8] sm:$0xff]  ;;  %v85_v42 = vld [vmem:[%s1335_s0 + $0x1d0] sm:$0xff]  ;;  %v70_v45 = vld [vmem:[%s1335_s0 + $0x158] sm:$0xff] }
  0x12   :  { %v37_v43 = vld [vmem:[%s1335_s0 + $0x50] sm:$0xff]  ;;  %v86_v46 = vld [vmem:[%s1335_s0 + $0x1d8] sm:$0xff]  ;;  %v71_v49 = vld [vmem:[%s1335_s0 + $0x160] sm:$0xff] }
  0x13   :  { %v53_v44 = vld [vmem:[%s1335_s0 + $0xd0] sm:$0xff]  ;;  %v38_v47 = vld [vmem:[%s1335_s0 + $0x58] sm:$0xff]  ;;  %v87_v50 = vld [vmem:[%s1335_s0 + $0x1e0] sm:$0xff] }
  0x14   :  { %772 = vmatmul.msk.f32.gmra.mxu2 %vm96_vm1, %v61_v9  ;;  %788 = vmatmul.msk.f32.gmra.mxu3 %vm96_vm1, %v77_v10  ;;  %v54_v48 = vld [vmem:[%s1335_s0 + $0xd8] sm:$0xff]  ;;  %v39_v51 = vld [vmem:[%s1335_s0 + $0x60] sm:$0xff]  ;;  %v72_v53 = vld [vmem:[%s1335_s0 + $0x168] sm:$0xff] }
  0x15   :  { %v55_v52 = vld [vmem:[%s1335_s0 + $0xe0] sm:$0xff]  ;;  %v88_v54 = vld [vmem:[%s1335_s0 + $0x1e8] sm:$0xff]  ;;  %v73_v57 = vld [vmem:[%s1335_s0 + $0x170] sm:$0xff] }
  0x16   :  { %740 = vmatmul.msk.f32.gmra.mxu0 %vm96_vm1, %v29_v11  ;;  %756 = vmatmul.msk.f32.gmra.mxu1 %vm96_vm1, %v45_v12  ;;  %v40_v55 = vld [vmem:[%s1335_s0 + $0x68] sm:$0xff]  ;;  %v89_v58 = vld [vmem:[%s1335_s0 + $0x1f0] sm:$0xff]  ;;  %v74_v61 = vld [vmem:[%s1335_s0 + $0x178] sm:$0xff] }
  0x17   :  { %v56_v56 = vld [vmem:[%s1335_s0 + $0xe8] sm:$0xff]  ;;  %v41_v59 = vld [vmem:[%s1335_s0 + $0x70] sm:$0xff]  ;;  %v90_v62 = vld [vmem:[%s1335_s0 + $0x1f8] sm:$0xff] }
  0x18   :  { %v57_v60 = vld [vmem:[%s1335_s0 + $0xf0] sm:$0xff]  ;;  %v42_v63 = vld [vmem:[%s1335_s0 + $0x78] sm:$0xff]  ;;  %v1179_v1 = vld [vmem:[%s1337_s2] ss:$0 sm:$0xff] }
  0x19   :  { %v58_v0 = vld [vmem:[%s1335_s0 + $0xf8] sm:$0xff]  ;;  %s868_s0 = smov 0  }
  0x1c   :  { %773 = vmatmul.msk.f32.gmra.mxu2 %vm96_vm1, %v62_v13  ;;  %789 = vmatmul.msk.f32.gmra.mxu3 %vm96_vm1, %v78_v14 }
  0x1e   :  { %741 = vmatmul.msk.f32.gmra.mxu0 %vm96_vm1, %v30_v15  ;;  %757 = vmatmul.msk.f32.gmra.mxu1 %vm96_vm1, %v46_v16 }
  0x24   :  { %774 = vmatmul.msk.f32.gmra.mxu2 %vm96_vm1, %v63_v17  ;;  %790 = vmatmul.msk.f32.gmra.mxu3 %vm96_vm1, %v79_v18 }
  0x26   :  { %742 = vmatmul.msk.f32.gmra.mxu0 %vm96_vm1, %v31_v19  ;;  %758 = vmatmul.msk.f32.gmra.mxu1 %vm96_vm1, %v47_v20 }
  0x2c   :  { %775 = vmatmul.msk.f32.gmra.mxu2 %vm96_vm1, %v64_v21  ;;  %791 = vmatmul.msk.f32.gmra.mxu3 %vm96_vm1, %v80_v22 }
  0x2e   :  { %743 = vmatmul.msk.f32.gmra.mxu0 %vm96_vm1, %v32_v23  ;;  %759 = vmatmul.msk.f32.gmra.mxu1 %vm96_vm1, %v48_v24 }
  0x34   :  { %776 = vmatmul.msk.f32.gmra.mxu2 %vm96_vm1, %v65_v25  ;;  %792 = vmatmul.msk.f32.gmra.mxu3 %vm96_vm1, %v81_v26 }
  0x36   :  { %744 = vmatmul.msk.f32.gmra.mxu0 %vm96_vm1, %v33_v27  ;;  %760 = vmatmul.msk.f32.gmra.mxu1 %vm96_vm1, %v49_v28 }
  0x3c   :  { %777 = vmatmul.msk.f32.gmra.mxu2 %vm96_vm1, %v66_v29  ;;  %793 = vmatmul.msk.f32.gmra.mxu3 %vm96_vm1, %v82_v30 }
  0x3e   :  { %745 = vmatmul.msk.f32.gmra.mxu0 %vm96_vm1, %v34_v31  ;;  %761 = vmatmul.msk.f32.gmra.mxu1 %vm96_vm1, %v50_v32 }
  0x44   :  { %778 = vmatmul.msk.f32.gmra.mxu2 %vm96_vm1, %v67_v33  ;;  %794 = vmatmul.msk.f32.gmra.mxu3 %vm96_vm1, %v83_v34 }
  0x46   :  { %746 = vmatmul.msk.f32.gmra.mxu0 %vm96_vm1, %v35_v35  ;;  %762 = vmatmul.msk.f32.gmra.mxu1 %vm96_vm1, %v51_v36 }
  0x4c   :  { %779 = vmatmul.msk.f32.gmra.mxu2 %vm96_vm1, %v68_v37  ;;  %795 = vmatmul.msk.f32.gmra.mxu3 %vm96_vm1, %v84_v38 }
  0x4e   :  { %747 = vmatmul.msk.f32.gmra.mxu0 %vm96_vm1, %v36_v39  ;;  %763 = vmatmul.msk.f32.gmra.mxu1 %vm96_vm1, %v52_v40 }
  0x54   :  { %780 = vmatmul.msk.f32.gmra.mxu2 %vm96_vm1, %v69_v41  ;;  %796 = vmatmul.msk.f32.gmra.mxu3 %vm96_vm1, %v85_v42 }
  0x56   :  { %748 = vmatmul.msk.f32.gmra.mxu0 %vm96_vm1, %v37_v43  ;;  %764 = vmatmul.msk.f32.gmra.mxu1 %vm96_vm1, %v53_v44 }
  0x5c   :  { %781 = vmatmul.msk.f32.gmra.mxu2 %vm96_vm1, %v70_v45  ;;  %797 = vmatmul.msk.f32.gmra.mxu3 %vm96_vm1, %v86_v46 }
  0x5e   :  { %749 = vmatmul.msk.f32.gmra.mxu0 %vm96_vm1, %v38_v47  ;;  %765 = vmatmul.msk.f32.gmra.mxu1 %vm96_vm1, %v54_v48 }
  0x64   :  { %782 = vmatmul.msk.f32.gmra.mxu2 %vm96_vm1, %v71_v49  ;;  %798 = vmatmul.msk.f32.gmra.mxu3 %vm96_vm1, %v87_v50 }
  0x66   :  { %750 = vmatmul.msk.f32.gmra.mxu0 %vm96_vm1, %v39_v51  ;;  %766 = vmatmul.msk.f32.gmra.mxu1 %vm96_vm1, %v55_v52 }
  0x6c   :  { %783 = vmatmul.msk.f32.gmra.mxu2 %vm96_vm1, %v72_v53  ;;  %799 = vmatmul.msk.f32.gmra.mxu3 %vm96_vm1, %v88_v54 }
  0x6e   :  { %751 = vmatmul.msk.f32.gmra.mxu0 %vm96_vm1, %v40_v55  ;;  %767 = vmatmul.msk.f32.gmra.mxu1 %vm96_vm1, %v56_v56 }
  0x74   :  { %784 = vmatmul.msk.f32.gmra.mxu2 %vm96_vm1, %v73_v57  ;;  %800 = vmatmul.msk.f32.gmra.mxu3 %vm96_vm1, %v89_v58 }
  0x76   :  { %752 = vmatmul.msk.f32.gmra.mxu0 %vm96_vm1, %v41_v59  ;;  %768 = vmatmul.msk.f32.gmra.mxu1 %vm96_vm1, %v57_v60 }
  0x7c   :  { %785 = vmatmul.msk.f32.gmra.mxu2 %vm96_vm1, %v74_v61  ;;  %801 = vmatmul.msk.f32.gmra.mxu3 %vm96_vm1, %v90_v62 }
  0x7e   :  { %753 = vmatmul.msk.f32.gmra.mxu0 %vm96_vm1, %v42_v63  ;;  %769 = vmatmul.msk.f32.gmra.mxu1 %vm96_vm1, %v58_v0 }
  0x83   :  { %v310_v2 = vpop.f32.mrf.mxu0  ;;  %v358_v3 = vpop.f32.mrf.mxu1 }
  0x84   :  { %v311_v4 = vadd.f32 %v1179_v1, %v310_v2  ;;  %v359_v5 = vadd.f32 %v1179_v1, %v358_v3 }
  0x86   :  { %v502_v6 = vmax.f32 %v311_v4, 0.0  ;;  %v518_v7 = vmax.f32 %v359_v5, 0.0 }
  0x87   :  { %v406_v8 = vpop.f32.mrf.mxu2  ;;  %v454_v9 = vpop.f32.mrf.mxu3 }
  0x88   :  { %566 = vst.msk [vmem:[#allocation2] sm:$0xff] %vm96_vm1, %v502_v6  ;;  %v407_v10 = vadd.f32 %v1179_v1, %v406_v8  ;;  %v455_v11 = vadd.f32 %v1179_v1, %v454_v9 }
  0x89   :  { %582 = vst.msk [vmem:[#allocation2 + $0x80] sm:$0xff] %vm96_vm1, %v518_v7 }
  0x8a   :  { %v534_v12 = vmax.f32 %v407_v10, 0.0  ;;  %v550_v13 = vmax.f32 %v455_v11, 0.0 }
  0x8b   :  { %v313_v14 = vpop.f32.mrf.mxu0  ;;  %v361_v15 = vpop.f32.mrf.mxu1 }
  0x8c   :  { %598 = vst.msk [vmem:[#allocation2 + $0x100] sm:$0xff] %vm96_vm1, %v534_v12  ;;  %v314_v16 = vadd.f32 %v1179_v1, %v313_v14  ;;  %v362_v17 = vadd.f32 %v1179_v1, %v361_v15 }
  0x8d   :  { %614 = vst.msk [vmem:[#allocation2 + $0x180] sm:$0xff] %vm96_vm1, %v550_v13 }
  0x8e   :  { %v503_v18 = vmax.f32 %v314_v16, 0.0  ;;  %v519_v19 = vmax.f32 %v362_v17, 0.0 }
  0x8f   :  { %v409_v20 = vpop.f32.mrf.mxu2  ;;  %v457_v21 = vpop.f32.mrf.mxu3 }
  0x90   :  { %567 = vst.msk [vmem:[#allocation2 + $0x8] sm:$0xff] %vm96_vm1, %v503_v18  ;;  %v410_v22 = vadd.f32 %v1179_v1, %v409_v20  ;;  %v458_v23 = vadd.f32 %v1179_v1, %v457_v21 }
  0x91   :  { %583 = vst.msk [vmem:[#allocation2 + $0x88] sm:$0xff] %vm96_vm1, %v519_v19 }
  0x92   :  { %v535_v24 = vmax.f32 %v410_v22, 0.0  ;;  %v551_v25 = vmax.f32 %v458_v23, 0.0 }
  0x93   :  { %v316_v26 = vpop.f32.mrf.mxu0  ;;  %v364_v27 = vpop.f32.mrf.mxu1 }
  0x94   :  { %599 = vst.msk [vmem:[#allocation2 + $0x108] sm:$0xff] %vm96_vm1, %v535_v24  ;;  %v317_v28 = vadd.f32 %v1179_v1, %v316_v26  ;;  %v365_v29 = vadd.f32 %v1179_v1, %v364_v27 }
  0x95   :  { %615 = vst.msk [vmem:[#allocation2 + $0x188] sm:$0xff] %vm96_vm1, %v551_v25 }
  0x96   :  { %v504_v30 = vmax.f32 %v317_v28, 0.0  ;;  %v520_v31 = vmax.f32 %v365_v29, 0.0 }
  0x97   :  { %v412_v32 = vpop.f32.mrf.mxu2  ;;  %v460_v33 = vpop.f32.mrf.mxu3 }
  0x98   :  { %568 = vst.msk [vmem:[#allocation2 + $0x10] sm:$0xff] %vm96_vm1, %v504_v30  ;;  %v413_v34 = vadd.f32 %v1179_v1, %v412_v32  ;;  %v461_v35 = vadd.f32 %v1179_v1, %v460_v33 }
  0x99   :  { %584 = vst.msk [vmem:[#allocation2 + $0x90] sm:$0xff] %vm96_vm1, %v520_v31 }
  0x9a   :  { %v536_v36 = vmax.f32 %v413_v34, 0.0  ;;  %v552_v37 = vmax.f32 %v461_v35, 0.0 }
  0x9b   :  { %v319_v38 = vpop.f32.mrf.mxu0  ;;  %v367_v39 = vpop.f32.mrf.mxu1 }
  0x9c   :  { %600 = vst.msk [vmem:[#allocation2 + $0x110] sm:$0xff] %vm96_vm1, %v536_v36  ;;  %v320_v40 = vadd.f32 %v1179_v1, %v319_v38  ;;  %v368_v41 = vadd.f32 %v1179_v1, %v367_v39 }
  0x9d   :  { %616 = vst.msk [vmem:[#allocation2 + $0x190] sm:$0xff] %vm96_vm1, %v552_v37 }
  0x9e   :  { %v505_v42 = vmax.f32 %v320_v40, 0.0  ;;  %v521_v43 = vmax.f32 %v368_v41, 0.0 }
  0x9f   :  { %v415_v44 = vpop.f32.mrf.mxu2  ;;  %v463_v45 = vpop.f32.mrf.mxu3 }
  0xa0   :  { %569 = vst.msk [vmem:[#allocation2 + $0x18] sm:$0xff] %vm96_vm1, %v505_v42  ;;  %v416_v46 = vadd.f32 %v1179_v1, %v415_v44  ;;  %v464_v47 = vadd.f32 %v1179_v1, %v463_v45 }
  0xa1   :  { %585 = vst.msk [vmem:[#allocation2 + $0x98] sm:$0xff] %vm96_vm1, %v521_v43 }
  0xa2   :  { %v537_v48 = vmax.f32 %v416_v46, 0.0  ;;  %v553_v49 = vmax.f32 %v464_v47, 0.0 }
  0xa3   :  { %v322_v50 = vpop.f32.mrf.mxu0  ;;  %v370_v51 = vpop.f32.mrf.mxu1 }
  0xa4   :  { %601 = vst.msk [vmem:[#allocation2 + $0x118] sm:$0xff] %vm96_vm1, %v537_v48  ;;  %v323_v52 = vadd.f32 %v1179_v1, %v322_v50  ;;  %v371_v53 = vadd.f32 %v1179_v1, %v370_v51 }
  0xa5   :  { %617 = vst.msk [vmem:[#allocation2 + $0x198] sm:$0xff] %vm96_vm1, %v553_v49 }
  0xa6   :  { %v506_v54 = vmax.f32 %v323_v52, 0.0  ;;  %v522_v55 = vmax.f32 %v371_v53, 0.0 }
  0xa7   :  { %v418_v56 = vpop.f32.mrf.mxu2  ;;  %v466_v57 = vpop.f32.mrf.mxu3 }
  0xa8   :  { %570 = vst.msk [vmem:[#allocation2 + $0x20] sm:$0xff] %vm96_vm1, %v506_v54  ;;  %v419_v58 = vadd.f32 %v1179_v1, %v418_v56  ;;  %v467_v59 = vadd.f32 %v1179_v1, %v466_v57 }
  0xa9   :  { %586 = vst.msk [vmem:[#allocation2 + $0xa0] sm:$0xff] %vm96_vm1, %v522_v55 }
  0xaa   :  { %v538_v60 = vmax.f32 %v419_v58, 0.0  ;;  %v554_v61 = vmax.f32 %v467_v59, 0.0 }
  0xab   :  { %v325_v62 = vpop.f32.mrf.mxu0  ;;  %v373_v63 = vpop.f32.mrf.mxu1 }
  0xac   :  { %602 = vst.msk [vmem:[#allocation2 + $0x120] sm:$0xff] %vm96_vm1, %v538_v60  ;;  %v326_v0 = vadd.f32 %v1179_v1, %v325_v62  ;;  %v374_v2 = vadd.f32 %v1179_v1, %v373_v63 }
  0xad   :  { %618 = vst.msk [vmem:[#allocation2 + $0x1a0] sm:$0xff] %vm96_vm1, %v554_v61 }
  0xae   :  { %v507_v3 = vmax.f32 %v326_v0, 0.0  ;;  %v523_v4 = vmax.f32 %v374_v2, 0.0 }
  0xaf   :  { %v421_v5 = vpop.f32.mrf.mxu2  ;;  %v469_v6 = vpop.f32.mrf.mxu3 }
  0xb0   :  { %571 = vst.msk [vmem:[#allocation2 + $0x28] sm:$0xff] %vm96_vm1, %v507_v3  ;;  %v422_v7 = vadd.f32 %v1179_v1, %v421_v5  ;;  %v470_v8 = vadd.f32 %v1179_v1, %v469_v6 }
  0xb1   :  { %587 = vst.msk [vmem:[#allocation2 + $0xa8] sm:$0xff] %vm96_vm1, %v523_v4 }
  0xb2   :  { %v539_v9 = vmax.f32 %v422_v7, 0.0  ;;  %v555_v10 = vmax.f32 %v470_v8, 0.0 }
  0xb3   :  { %v328_v11 = vpop.f32.mrf.mxu0  ;;  %v376_v12 = vpop.f32.mrf.mxu1 }
  0xb4   :  { %603 = vst.msk [vmem:[#allocation2 + $0x128] sm:$0xff] %vm96_vm1, %v539_v9  ;;  %v329_v13 = vadd.f32 %v1179_v1, %v328_v11  ;;  %v377_v14 = vadd.f32 %v1179_v1, %v376_v12 }
  0xb5   :  { %619 = vst.msk [vmem:[#allocation2 + $0x1a8] sm:$0xff] %vm96_vm1, %v555_v10 }
  0xb6   :  { %v508_v15 = vmax.f32 %v329_v13, 0.0  ;;  %v524_v16 = vmax.f32 %v377_v14, 0.0 }
  0xb7   :  { %v424_v17 = vpop.f32.mrf.mxu2  ;;  %v472_v18 = vpop.f32.mrf.mxu3 }
  0xb8   :  { %572 = vst.msk [vmem:[#allocation2 + $0x30] sm:$0xff] %vm96_vm1, %v508_v15  ;;  %v425_v19 = vadd.f32 %v1179_v1, %v424_v17  ;;  %v473_v20 = vadd.f32 %v1179_v1, %v472_v18 }
  0xb9   :  { %588 = vst.msk [vmem:[#allocation2 + $0xb0] sm:$0xff] %vm96_vm1, %v524_v16 }
  0xba   :  { %v540_v21 = vmax.f32 %v425_v19, 0.0  ;;  %v556_v22 = vmax.f32 %v473_v20, 0.0 }
  0xbb   :  { %v331_v23 = vpop.f32.mrf.mxu0  ;;  %v379_v24 = vpop.f32.mrf.mxu1 }
  0xbc   :  { %604 = vst.msk [vmem:[#allocation2 + $0x130] sm:$0xff] %vm96_vm1, %v540_v21  ;;  %v332_v25 = vadd.f32 %v1179_v1, %v331_v23  ;;  %v380_v26 = vadd.f32 %v1179_v1, %v379_v24 }
  0xbd   :  { %620 = vst.msk [vmem:[#allocation2 + $0x1b0] sm:$0xff] %vm96_vm1, %v556_v22 }
  0xbe   :  { %v509_v27 = vmax.f32 %v332_v25, 0.0  ;;  %v525_v28 = vmax.f32 %v380_v26, 0.0 }
  0xbf   :  { %v427_v29 = vpop.f32.mrf.mxu2  ;;  %v475_v30 = vpop.f32.mrf.mxu3 }
  0xc0   :  { %573 = vst.msk [vmem:[#allocation2 + $0x38] sm:$0xff] %vm96_vm1, %v509_v27  ;;  %v428_v31 = vadd.f32 %v1179_v1, %v427_v29  ;;  %v476_v32 = vadd.f32 %v1179_v1, %v475_v30 }
  0xc1   :  { %589 = vst.msk [vmem:[#allocation2 + $0xb8] sm:$0xff] %vm96_vm1, %v525_v28 }
  0xc2   :  { %v541_v33 = vmax.f32 %v428_v31, 0.0  ;;  %v557_v34 = vmax.f32 %v476_v32, 0.0 }
  0xc3   :  { %v334_v35 = vpop.f32.mrf.mxu0  ;;  %v382_v36 = vpop.f32.mrf.mxu1 }
  0xc4   :  { %605 = vst.msk [vmem:[#allocation2 + $0x138] sm:$0xff] %vm96_vm1, %v541_v33  ;;  %v335_v37 = vadd.f32 %v1179_v1, %v334_v35  ;;  %v383_v38 = vadd.f32 %v1179_v1, %v382_v36 }
  0xc5   :  { %621 = vst.msk [vmem:[#allocation2 + $0x1b8] sm:$0xff] %vm96_vm1, %v557_v34 }
  0xc6   :  { %v510_v39 = vmax.f32 %v335_v37, 0.0  ;;  %v526_v40 = vmax.f32 %v383_v38, 0.0 }
  0xc7   :  { %v430_v41 = vpop.f32.mrf.mxu2  ;;  %v478_v42 = vpop.f32.mrf.mxu3 }
  0xc8   :  { %574 = vst.msk [vmem:[#allocation2 + $0x40] sm:$0xff] %vm96_vm1, %v510_v39  ;;  %v431_v43 = vadd.f32 %v1179_v1, %v430_v41  ;;  %v479_v44 = vadd.f32 %v1179_v1, %v478_v42 }
  0xc9   :  { %590 = vst.msk [vmem:[#allocation2 + $0xc0] sm:$0xff] %vm96_vm1, %v526_v40 }
  0xca   :  { %v542_v45 = vmax.f32 %v431_v43, 0.0  ;;  %v558_v46 = vmax.f32 %v479_v44, 0.0 }
  0xcb   :  { %v337_v47 = vpop.f32.mrf.mxu0  ;;  %v385_v48 = vpop.f32.mrf.mxu1 }
  0xcc   :  { %606 = vst.msk [vmem:[#allocation2 + $0x140] sm:$0xff] %vm96_vm1, %v542_v45  ;;  %v338_v49 = vadd.f32 %v1179_v1, %v337_v47  ;;  %v386_v50 = vadd.f32 %v1179_v1, %v385_v48 }
  0xcd   :  { %622 = vst.msk [vmem:[#allocation2 + $0x1c0] sm:$0xff] %vm96_vm1, %v558_v46 }
  0xce   :  { %v511_v51 = vmax.f32 %v338_v49, 0.0  ;;  %v527_v52 = vmax.f32 %v386_v50, 0.0 }
  0xcf   :  { %v433_v53 = vpop.f32.mrf.mxu2  ;;  %v481_v54 = vpop.f32.mrf.mxu3 }
  0xd0   :  { %575 = vst.msk [vmem:[#allocation2 + $0x48] sm:$0xff] %vm96_vm1, %v511_v51  ;;  %v434_v55 = vadd.f32 %v1179_v1, %v433_v53  ;;  %v482_v56 = vadd.f32 %v1179_v1, %v481_v54 }
  0xd1   :  { %591 = vst.msk [vmem:[#allocation2 + $0xc8] sm:$0xff] %vm96_vm1, %v527_v52 }
  0xd2   :  { %v543_v57 = vmax.f32 %v434_v55, 0.0  ;;  %v559_v58 = vmax.f32 %v482_v56, 0.0 }
  0xd3   :  { %v340_v59 = vpop.f32.mrf.mxu0  ;;  %v388_v60 = vpop.f32.mrf.mxu1 }
  0xd4   :  { %607 = vst.msk [vmem:[#allocation2 + $0x148] sm:$0xff] %vm96_vm1, %v543_v57  ;;  %v341_v61 = vadd.f32 %v1179_v1, %v340_v59  ;;  %v389_v62 = vadd.f32 %v1179_v1, %v388_v60 }
  0xd5   :  { %623 = vst.msk [vmem:[#allocation2 + $0x1c8] sm:$0xff] %vm96_vm1, %v559_v58 }
  0xd6   :  { %v512_v63 = vmax.f32 %v341_v61, 0.0  ;;  %v528_v0 = vmax.f32 %v389_v62, 0.0 }
  0xd7   :  { %v436_v2 = vpop.f32.mrf.mxu2  ;;  %v484_v3 = vpop.f32.mrf.mxu3 }
  0xd8   :  { %576 = vst.msk [vmem:[#allocation2 + $0x50] sm:$0xff] %vm96_vm1, %v512_v63  ;;  %v437_v4 = vadd.f32 %v1179_v1, %v436_v2  ;;  %v485_v5 = vadd.f32 %v1179_v1, %v484_v3 }
  0xd9   :  { %592 = vst.msk [vmem:[#allocation2 + $0xd0] sm:$0xff] %vm96_vm1, %v528_v0 }
  0xda   :  { %v544_v6 = vmax.f32 %v437_v4, 0.0  ;;  %v560_v7 = vmax.f32 %v485_v5, 0.0  ;;  %v864_v5 = vmov 0.0  }
  0xdb   :  { %v343_v8 = vpop.f32.mrf.mxu0  ;;  %v391_v9 = vpop.f32.mrf.mxu1 }
  0xdc   :  { %608 = vst.msk [vmem:[#allocation2 + $0x150] sm:$0xff] %vm96_vm1, %v544_v6  ;;  %v344_v10 = vadd.f32 %v1179_v1, %v343_v8  ;;  %v392_v11 = vadd.f32 %v1179_v1, %v391_v9 }
  0xdd   :  { %624 = vst.msk [vmem:[#allocation2 + $0x1d0] sm:$0xff] %vm96_vm1, %v560_v7 }
  0xde   :  { %v513_v12 = vmax.f32 %v344_v10, 0.0  ;;  %v529_v13 = vmax.f32 %v392_v11, 0.0 }
  0xdf   :  { %v439_v14 = vpop.f32.mrf.mxu2  ;;  %v487_v15 = vpop.f32.mrf.mxu3 }
  0xe0   :  { %577 = vst.msk [vmem:[#allocation2 + $0x58] sm:$0xff] %vm96_vm1, %v513_v12  ;;  %v440_v16 = vadd.f32 %v1179_v1, %v439_v14  ;;  %v488_v17 = vadd.f32 %v1179_v1, %v487_v15 }
  0xe1   :  { %593 = vst.msk [vmem:[#allocation2 + $0xd8] sm:$0xff] %vm96_vm1, %v529_v13 }
  0xe2   :  { %v545_v18 = vmax.f32 %v440_v16, 0.0  ;;  %v561_v19 = vmax.f32 %v488_v17, 0.0 }
  0xe3   :  { %v346_v20 = vpop.f32.mrf.mxu0  ;;  %v394_v21 = vpop.f32.mrf.mxu1 }
  0xe4   :  { %609 = vst.msk [vmem:[#allocation2 + $0x158] sm:$0xff] %vm96_vm1, %v545_v18  ;;  %v347_v22 = vadd.f32 %v1179_v1, %v346_v20  ;;  %v395_v23 = vadd.f32 %v1179_v1, %v394_v21 }
  0xe5   :  { %625 = vst.msk [vmem:[#allocation2 + $0x1d8] sm:$0xff] %vm96_vm1, %v561_v19 }
  0xe6   :  { %v514_v24 = vmax.f32 %v347_v22, 0.0  ;;  %v530_v25 = vmax.f32 %v395_v23, 0.0 }
  0xe7   :  { %v442_v26 = vpop.f32.mrf.mxu2  ;;  %v490_v27 = vpop.f32.mrf.mxu3 }
  0xe8   :  { %578 = vst.msk [vmem:[#allocation2 + $0x60] sm:$0xff] %vm96_vm1, %v514_v24  ;;  %v443_v28 = vadd.f32 %v1179_v1, %v442_v26  ;;  %v491_v29 = vadd.f32 %v1179_v1, %v490_v27 }
  0xe9   :  { %594 = vst.msk [vmem:[#allocation2 + $0xe0] sm:$0xff] %vm96_vm1, %v530_v25 }
  0xea   :  { %v546_v30 = vmax.f32 %v443_v28, 0.0  ;;  %v562_v31 = vmax.f32 %v491_v29, 0.0 }
  0xeb   :  { %v349_v32 = vpop.f32.mrf.mxu0  ;;  %v397_v33 = vpop.f32.mrf.mxu1 }
  0xec   :  { %610 = vst.msk [vmem:[#allocation2 + $0x160] sm:$0xff] %vm96_vm1, %v546_v30  ;;  %v350_v34 = vadd.f32 %v1179_v1, %v349_v32  ;;  %v398_v35 = vadd.f32 %v1179_v1, %v397_v33 }
  0xed   :  { %626 = vst.msk [vmem:[#allocation2 + $0x1e0] sm:$0xff] %vm96_vm1, %v562_v31 }
  0xee   :  { %v515_v36 = vmax.f32 %v350_v34, 0.0  ;;  %v531_v37 = vmax.f32 %v398_v35, 0.0 }
  0xef   :  { %v445_v38 = vpop.f32.mrf.mxu2  ;;  %v493_v39 = vpop.f32.mrf.mxu3 }
  0xf0   :  { %579 = vst.msk [vmem:[#allocation2 + $0x68] sm:$0xff] %vm96_vm1, %v515_v36  ;;  %v446_v40 = vadd.f32 %v1179_v1, %v445_v38  ;;  %v494_v41 = vadd.f32 %v1179_v1, %v493_v39 }
  0xf1   :  { %595 = vst.msk [vmem:[#allocation2 + $0xe8] sm:$0xff] %vm96_vm1, %v531_v37 }
  0xf2   :  { %v547_v42 = vmax.f32 %v446_v40, 0.0  ;;  %v563_v43 = vmax.f32 %v494_v41, 0.0 }
  0xf3   :  { %v352_v44 = vpop.f32.mrf.mxu0  ;;  %v400_v45 = vpop.f32.mrf.mxu1 }
  0xf4   :  { %611 = vst.msk [vmem:[#allocation2 + $0x168] sm:$0xff] %vm96_vm1, %v547_v42  ;;  %v353_v46 = vadd.f32 %v1179_v1, %v352_v44  ;;  %v401_v47 = vadd.f32 %v1179_v1, %v400_v45 }
  0xf5   :  { %627 = vst.msk [vmem:[#allocation2 + $0x1e8] sm:$0xff] %vm96_vm1, %v563_v43 }
  0xf6   :  { %v516_v48 = vmax.f32 %v353_v46, 0.0  ;;  %v532_v49 = vmax.f32 %v401_v47, 0.0 }
  0xf7   :  { %v448_v50 = vpop.f32.mrf.mxu2  ;;  %v496_v51 = vpop.f32.mrf.mxu3 }
  0xf8   :  { %580 = vst.msk [vmem:[#allocation2 + $0x70] sm:$0xff] %vm96_vm1, %v516_v48  ;;  %v449_v52 = vadd.f32 %v1179_v1, %v448_v50  ;;  %v497_v53 = vadd.f32 %v1179_v1, %v496_v51 }
  0xf9   :  { %596 = vst.msk [vmem:[#allocation2 + $0xf0] sm:$0xff] %vm96_vm1, %v532_v49 }
  0xfa   :  { %v548_v54 = vmax.f32 %v449_v52, 0.0  ;;  %v564_v55 = vmax.f32 %v497_v53, 0.0 }
  0xfb   :  { %v355_v56 = vpop.f32.mrf.mxu0  ;;  %v403_v57 = vpop.f32.mrf.mxu1 }
  0xfc   :  { %612 = vst.msk [vmem:[#allocation2 + $0x170] sm:$0xff] %vm96_vm1, %v548_v54  ;;  %v356_v58 = vadd.f32 %v1179_v1, %v355_v56  ;;  %v404_v59 = vadd.f32 %v1179_v1, %v403_v57 }
  0xfd   :  { %628 = vst.msk [vmem:[#allocation2 + $0x1f0] sm:$0xff] %vm96_vm1, %v564_v55 }
  0xfe   :  { %v517_v60 = vmax.f32 %v356_v58, 0.0  ;;  %v533_v61 = vmax.f32 %v404_v59, 0.0 }
  0xff   :  { %v451_v62 = vpop.f32.mrf.mxu2  ;;  %v499_v63 = vpop.f32.mrf.mxu3 }
 0x100   :  { %581 = vst.msk [vmem:[#allocation2 + $0x78] sm:$0xff] %vm96_vm1, %v517_v60  ;;  %v452_v0 = vadd.f32 %v1179_v1, %v451_v62  ;;  %v500_v2 = vadd.f32 %v1179_v1, %v499_v63 }
 0x101   :  { %597 = vst.msk [vmem:[#allocation2 + $0xf8] sm:$0xff] %vm96_vm1, %v533_v61 }
 0x102   :  { %v549_v3 = vmax.f32 %v452_v0, 0.0  ;;  %v565_v4 = vmax.f32 %v500_v2, 0.0 }
 0x104   :  { %613 = vst.msk [vmem:[#allocation2 + $0x178] sm:$0xff] %vm96_vm1, %v549_v3 }
 0x105   :  { %629 = vst.msk [vmem:[#allocation2 + $0x1f8] sm:$0xff] %vm96_vm1, %v565_v4 }
 0x106 LB: > { %s803_s2 = sshll.u32 %s870_s0, 2  ;;  %s802_s12 = sshll.u32 %s870_s0, 3  ;;  %s870_s0 = sphi %s868_s0, %s635_s0   ;;  %v866_v5 = vphi %v864_v5, %v865_v5  }
 0x107   : > { %s641_s15 = scalar_lea.vmem %s1338_s3, %s803_s2  ;;  %s638_s16 = scalar_lea.vmem [#allocation2], %s802_s12 }
 0x108   : > { %v642_v1 = vld [vmem:[%s641_s15] sm:$0xf]  ;;  %s635_s0 = sadd.s32 1, %s870_s0  }
 0x109   : > { %804 = vmatpush.msk.msra.mxu0 %vm289_vm0, %v642_v1  ;;  %p632_p0 = scmp.ge.s32.totalorder %s635_s0, 64  }
 0x10a   :  { %v678_v9 = vld [vmem:[%s1340_s5 + $0x18] sm:$0xff] (%p632_p0)  ;;  %v677_v10 = vld [vmem:[%s1340_s5 + $0x10] sm:$0xff] (%p632_p0)  ;;  %v828_v11 = vld [vmem:[%s1339_s4] ss:$0 sm:$0xff] (%p632_p0)  ;;  %vm683_vm2 = vcmask (%p632_p0), 261120   ;;  %s872_s4 = smov (%p632_p0), [#allocation3]  }
 0x10b   :  { %v676_v12 = vld [vmem:[%s1340_s5 + $0x8] sm:$0xff] (%p632_p0)  ;;  %v675_v13 = vld [vmem:[%s1340_s5] sm:$0xff] (%p632_p0)  ;;  %s714_s28 = sshll.u32 (%p632_p0), %s872_s4, 4  ;;  %s716_s8 = sshll.u32 (%p632_p0), %s1342_s7, 4  ;;  %s715_s28 = int_to_ptr.vmem [resolvable:$true] %s714_s28  ;;  %s717_s8 = int_to_ptr.hbm [resolvable:$true] %s716_s8 }
 0x10c   : > { %v639_v6 = vld [vmem:[%s638_s16] sm:$0xff] }
 0x10d   : > { %805 = vmatmul.msk.f32.vlgmr.msra.gmra.mxu0 %vm96_vm1, %v639_v6  ;;  %v829_v15 = vld [vmem:[%s1341_s6] ss:$0 sm:$0xff] (%p632_p0) }
 0x10e   :  { %699 = vmatpush.msra.mxu0 (%p632_p0), %v678_v9 }
 0x110   :  { %700 = vmatpush.msra.mxu0 (%p632_p0), %v677_v10 }
 0x112   :  { %701 = vmatpush.msra.mxu0 (%p632_p0), %v676_v12 }
 0x114   :  { %702 = vmatpush.msra.mxu0 (%p632_p0), %v675_v13 }
 0x189   :  { %634 = sbr.rel (!%p632_p0) target bundleno = 262 (0x106), region = 57 }
 0x18a   : > { %v666_v7 = vpop.f32.mrf.mxu0 }
 0x18b   : > { %v669_v8 = vadd.f32 %v866_v5, %v666_v7  }
 0x18d   : > { %v865_v5 = vmov %v669_v8   ;;  %v674_v14 = vadd.f32 (%p632_p0), %v828_v11, %v669_v8 }
 0x18f   :  { %806 = vmatmul.msk.f32.vlgmr.msra.gmra.mxu0 %vm683_vm2, %v674_v14 }
 0x20c   :  { %v704_v16 = vpop.f32.mrf.mxu0 }
 0x20d   :  { %v705_v17 = vadd.f32 %v829_v15, %v704_v16 }
 0x20f   :  { %v707_v18 = vmax.f32 %v705_v17, 0.0 }
 0x211   :  { %708 = vst [vmem:[#allocation3] sm:$0xff] %v707_v18 }
 0x212   :  { %719 = dma.vmem_to_hbm [thread:$0]  %s715_s28, 128, %s717_s8, [#allocation4]  }
 0x213   :  { %862 = dma.done.wait [#allocation4], 128  }
 0x214   :  { %863 = vsyncadd [#allocation4], 4294967168 }
 0x215   :  { %724 = vsyncpa [#allocation4], 1 }

</bundles_post_ra>
